<compile_context>
chip_gen: v7x
topology: tpu7x:2x2x1
jax: 0.10.0
libtpu: 0.0.40
codegen_flags: <defaults>
</compile_context>

<pallas_src>
import math

import jax
import jax.numpy as jnp
from jax.experimental import pallas as pl
from jax.experimental.pallas import tpu as pltpu


_TARGET_BLOCK_BYTES = 4 * 1024 * 1024   # ~4 MiB of payload per grid block
_MIN_GRID_BLOCKS = 4                    # keep >=4 blocks when affordable
_TINY_BYTES = 64 * 1024                 # below this, pure jnp is cheaper
_VMEM_LIMIT_BYTES = 40 * 1024 * 1024    # safe on v5e/v6e/v7x


def _hswish_math(x):
    # h_sigmoid(x) = relu6(x + 3) / 6 ; h_swish(x) = x * h_sigmoid(x)
    return x * (jnp.clip(x + 3.0, 0.0, 6.0) * (1.0 / 6.0))


def _h_swish_kernel(x_ref, o_ref):
    x = x_ref[...]
    o_ref[...] = _hswish_math(x).astype(o_ref.dtype)


def h_swish(x):
    """Elementwise hard-swish; semantics identical to the PyTorch module."""
    orig_shape = x.shape
    orig_dtype = x.dtype

    # Empty-tensor guard.
    if x.size == 0:
        return x

    total = int(math.prod(orig_shape)) if orig_shape else 1
    itemsize = jnp.dtype(orig_dtype).itemsize

    # Tiny-tensor fast path: kernel launch overhead dominates, and XLA can
    # fuse this expression into neighbouring ops.
    if total * itemsize <= _TINY_BYTES:
        return _hswish_math(x).astype(orig_dtype)

    # Pick a lane width that divides the element count (zero-copy common
    # case); fall back to 128 lanes with minimal padding otherwise.
    lanes = None
    for cand in (512, 256, 128):
        if total % cand == 0:
            lanes = cand
            break
    if lanes is None:
        lanes = 128
        padded_total = pl.cdiv(total, lanes) * lanes
    else:
        padded_total = total
    rows = padded_total // lanes

    # Sublane tile granularity per dtype (f32:8, bf16:16, int8/fp8:32).
    sublane_mult = max(8, 32 // itemsize)

    # Dtype-aware block sizing: hold block *bytes* ~constant.
    block_rows = _TARGET_BLOCK_BYTES // (lanes * itemsize)
    block_rows = max(sublane_mult, (block_rows // sublane_mult) * sublane_mult)

    # Guarantee several grid blocks for medium tensors (pipelining + dual-TC).
    desired = pl.cdiv(rows, _MIN_GRID_BLOCKS)
    desired = pl.cdiv(desired, sublane_mult) * sublane_mult
    block_rows = min(block_rows, max(desired, sublane_mult))

    if block_rows >= rows:
        # Single block exactly matching the array (always layout-legal).
        block_rows = rows
    num_blocks = pl.cdiv(rows, block_rows)

    flat = x.reshape(-1)
    if padded_total != total:
        # Rare path: only when total is not a multiple of 128.
        flat = jnp.pad(flat, (0, padded_total - total))
    x2d = flat.reshape(rows, lanes)

    out2d = pl.pallas_call(
        _h_swish_kernel,
        out_shape=jax.ShapeDtypeStruct((rows, lanes), orig_dtype),
        grid=(num_blocks,),
        in_specs=[pl.BlockSpec((block_rows, lanes), lambda i: (i, 0))],
        out_specs=pl.BlockSpec((block_rows, lanes), lambda i: (i, 0)),
        compiler_params=pltpu.CompilerParams(
            dimension_semantics=("parallel",),
            vmem_limit_bytes=_VMEM_LIMIT_BYTES),
        cost_estimate=pl.CostEstimate(
            flops=5 * padded_total,
            transcendentals=0,
            bytes_accessed=2 * padded_total * itemsize),
    )(x2d)

    out_flat = out2d.reshape(-1)
    if padded_total != total:
        out_flat = out_flat[:total]
    return out_flat.reshape(orig_shape)


def _ref(x):
    return x * (jnp.clip(x + 3.0, 0.0, 6.0) / 6.0)


if __name__ == "__main__":
    key = jax.random.PRNGKey(0)

    # 1) Spec-sized input (NCHW, matching the PyTorch model family).
    #    This is small enough to take the fused tiny-tensor path.
    x = jax.random.normal(key, (2, 4, 16, 16), dtype=jnp.float32) * 4.0
    out = jax.block_until_ready(h_swish(x))
    assert out.shape == x.shape and out.dtype == x.dtype
    assert jnp.max(jnp.abs(out - _ref(x))) < 1e-5

    # 2) Larger activation-like shape -> exercises the Pallas kernel with
    #    multiple grid blocks and a zero-copy lane-dense fold (total % 512 == 0).
    x2 = jax.random.normal(jax.random.PRNGKey(1), (2, 16, 56, 56),
                           dtype=jnp.float32) * 4.0
    out2 = jax.block_until_ready(h_swish(x2))
    assert out2.shape == x2.shape and out2.dtype == x2.dtype
    assert jnp.max(jnp.abs(out2 - _ref(x2))) < 1e-5

    # 3) Awkward shape (total not a multiple of 128) -> minimal-pad fallback
    #    plus a partial (masked) last row-block inside the kernel.
    x3 = jax.random.normal(jax.random.PRNGKey(2), (3, 7, 33, 129),
                           dtype=jnp.float32) * 4.0
    out3 = jax.block_until_ready(h_swish(x3))
    assert out3.shape == x3.shape and out3.dtype == x3.dtype
    assert jnp.max(jnp.abs(out3 - _ref(x3))) < 1e-5

    # 4) bf16 input -> dtype-aware block sizing path.
    x4 = (jax.random.normal(jax.random.PRNGKey(3), (2, 32, 32, 64),
                            dtype=jnp.float32) * 4.0).astype(jnp.bfloat16)
    out4 = jax.block_until_ready(h_swish(x4))
    assert out4.shape == x4.shape and out4.dtype == x4.dtype
    assert jnp.max(jnp.abs(out4.astype(jnp.float32)
                           - _ref(x4.astype(jnp.float32)))) < 6e-2

    print("KERNEL_OK")
</pallas_src>

<mosaic_0001>
module attributes {stable_mosaic.version = 11 : i64} {
  func.func @_h_swish_kernel(%arg0: i32, %arg1: memref<56x512xf32, #tpu.memory_space<vmem>>, %arg2: memref<56x512xf32, #tpu.memory_space<vmem>>) attributes {dimension_semantics = [#tpu.dimension_semantics<parallel>], iteration_bounds = array<i64: 4>, scalar_prefetch = 0 : i64, scratch_operands = 0 : i64, tpu.core_type = #tpu.core_type<tc>, window_params = [{transform_indices = @transform_0, window_bounds = array<i64: 56, 512>}, {transform_indices = @transform_1, window_bounds = array<i64: 56, 512>}]} {
    %c0 = arith.constant 0 : index
    %c0_0 = arith.constant 0 : index
    %0 = vector.load %arg1[%c0, %c0_0] : memref<56x512xf32, #tpu.memory_space<vmem>>, vector<56x512xf32>
    %cst = arith.constant 3.000000e+00 : f32
    %1 = vector.broadcast %cst : f32 to vector<56x512xf32>
    %2 = arith.addf %0, %1 : vector<56x512xf32>
    %cst_1 = arith.constant 0.000000e+00 : f32
    %cst_2 = arith.constant 6.000000e+00 : f32
    %3 = vector.broadcast %cst_1 : f32 to vector<56x512xf32>
    %4 = arith.maximumf %3, %2 : vector<56x512xf32>
    %5 = vector.broadcast %cst_2 : f32 to vector<56x512xf32>
    %6 = arith.minimumf %5, %4 : vector<56x512xf32>
    %cst_3 = arith.constant 0.166666672 : f32
    %7 = vector.broadcast %cst_3 : f32 to vector<56x512xf32>
    %8 = arith.mulf %6, %7 : vector<56x512xf32>
    %9 = arith.mulf %0, %8 : vector<56x512xf32>
    %c0_4 = arith.constant 0 : index
    %c0_5 = arith.constant 0 : index
    %10 = vector.load %arg2[%c0_4, %c0_5] : memref<56x512xf32, #tpu.memory_space<vmem>>, vector<56x512xf32>
    tpu.vector_store %arg2[%c0_4, %c0_5], %9 {strides = array<i32>} : memref<56x512xf32, #tpu.memory_space<vmem>>, vector<56x512xf32>,
    return
  }
  func.func @transform_0(%arg0: i32) -> (i32, i32) {
    %c0_i32 = arith.constant 0 : i32
    %c0_i32_0 = arith.constant 0 : i32
    return %arg0, %c0_i32 : i32, i32
  }
  func.func @transform_1(%arg0: i32) -> (i32, i32) {
    %c0_i32 = arith.constant 0 : i32
    %c0_i32_0 = arith.constant 0 : i32
    return %arg0, %c0_i32 : i32, i32
  }
}

</mosaic_0001>

<bundles_post_ra>
// kernel: tpu_custom_call.1
= control target key start
LH: loop header
LB: loop body
LE: loop exit
PB: predicated region body
PF: predicated region fallthrough
CT: control target
= control target key end

     0   :  { %6 = vsyncpa [#allocation3], 0  ;;  %s891_s0 = inlined_call_operand.hbm [shape: f32[196,512], index: 0, kind: input, shape index: {}]   ;;  %s892_s1 = inlined_call_operand.hbm [shape: f32[196,512], index: 1, kind: output, shape index: {}]  }
   0x1   :  { %8 = vsyncpa [#allocation3 + $0x1], 0 }
   0x2   :  { %9 = vsyncpa [#allocation4], 0 }
   0x3   :  { %11 = vsyncpa [#allocation4 + $0x1], 0  ;;  %s631_s6 = smov 0   ;;  %s633_s7 = smov 0  }
   0x4   :  { %s635_s8 = smov 0   ;;  %s637_s9 = smov 0  }
   0x5 LB: > { %s652_s10 = sadd.s32 4294967295, %s613_s9   ;;  %s446_s11 = sadd.s32 4294967294, %s613_s9   ;;  %s613_s9 = sphi %s637_s9, %s900_s9   ;;  %s609_s8 = sphi %s635_s8, %s899_s8   ;;  %s605_s7 = sphi %s633_s7, %s898_s7   ;;  %s601_s6 = sphi %s631_s6, %s897_s6  }
   0x6   : > { %s656_s12 = sadd.s32 1, %s613_s9   ;;  %s24_s13 = sadd.s32 1, %s609_s8 }
   0x7   : > { %s21_s14 = ssub.s32 %s613_s9, %s656_s12  ;;  %p31_p0 = scmp.ne.s32.totalorder %s609_s8, %s605_s7 }
   0x8   : > { %p22_p1 = scmp.eq.s32.totalorder %s21_s14, 0  ;;  %p32_p2 = scmp.eq.s32.totalorder %s613_s9, 0 }
   0x9   : > { %p37_p3 = scmp.ne.s32.totalorder %s605_s7, %s601_s6  ;;  %p38_p4 = scmp.eq.s32.totalorder %s652_s10, 0 }
   0xa   : > { %s668_s15 = scalar_select %p22_p1, %s609_s8, %s24_s13  }
   0xb   : > { %p33_p5 = por %p32_p2, %p31_p0  ;;  %p670_p6 = por %p38_p4, %p37_p3 }
   0xc   : > { %p61_p7 = scmp.eq.s32.totalorder %s652_s10, 3  ;;  %p67_p8 = scmp.eq.s32.totalorder %s446_s11, 3 }
   0xd   : > { %p448_p11 = scmp.ge.s32.totalorder %s613_s9, 4 }
   0xe   : > { %p675_p9 = por %p61_p7, %p31_p0  ;;  %p679_p10 = por %p67_p8, %p37_p3 }
   0xf   : > { %83 = sbr.rel (%p448_p11) target bundleno = 57 (0x39), region = 16 }
  0x10   : > { %s895_s18 = scalar_select %p679_p10, 1, 0 }
  0x16   : > { %86 = sbr.rel (!%p33_p5) target bundleno = 57 (0x39), region = 20  ;;  %s87_s19 = sand.u32 (%p33_p5), 1, %s609_s8  }
  0x17   : > { %s92_s20 = smul.u32 (%p33_p5), 7, %s613_s9  ;;  %s689_s25 = scalar_lea.sflag (%p33_p5), [#allocation3], %s87_s19 }
  0x18   : > { %s474_s21 = smul.u32 (%p33_p5), 224, %s87_s19 }
  0x19   : > { %s93_s22 = ssub.s32 (%p33_p5), 25, %s92_s20 }
  0x1a   : > { %p94_p12 = scmp.lt.s32.totalorder (%p33_p5), %s93_s22, 7  ;;  %s91_s26 = scalar_lea.vmem (%p33_p5), [#allocation2], %s474_s21 }
  0x1d   : > { %s902_s22 = smov (!%p94_p12, %s93_s22), 7 }
  0x1e   : > { %s686_s23 = sshll.u32 %s902_s22, 9 }
  0x1f   : > { %s99_s24 = ssub.s32 3584, %s686_s23 }
  0x20   : > { %100 = vsyncadd %s689_s25, %s99_s24  ;;  %p451_p13 = scmp.ne.s32.totalorder %s686_s23, 0  ;;  %s472_s27 = smul.u32 3584, %s613_s9 }
  0x21   : > { %s106_s28 = sshll.u32 %s91_s26, 4  ;;  %s523_s11 = scalar_lea.hbm %s891_s0, 12800  ;;  %s699_s28 = int_to_ptr.vmem [resolvable:$true] %s106_s28 }
  0x22   : > { %s697_s2 = scalar_lea.hbm %s891_s0, %s472_s27 }
  0x23   : > { %s519_s3 = scalar_lea.hbm %s697_s2, %s686_s23  ;;  %p524_p3 = scmp.lt.u32.totalorder %s697_s2, %s891_s0 }
  0x24   : > { %p520_p0 = scmp.ne.s32.totalorder %s697_s2, %s519_s3  ;;  %p525_p4 = scmp.lt.u32.totalorder %s523_s11, %s519_s3 }
  0x25   : > { %p527_p7 = scmp.lt.u32.totalorder %s519_s3, %s697_s2 }
  0x26   : > { %p521_p1 = pnand %p520_p0, %p451_p13  ;;  %p526_p5 = por %p525_p4, %p524_p3 }
  0x28   : > { %p522_p2 = pneg %p521_p1  ;;  %p528_p8 = por %p527_p7, %p526_p5 }
  0x2a   : > { %p529_p11 = pnand %p528_p8, %p522_p2 }
  0x2c   : > { %532 = shalt.err (!%p529_p11)
}
  0x2d   : > { %s533_s19 = scalar_lea.vmem %s699_s28, %s686_s23  ;;  %s615_s20 = smov [#allocation2]  }
  0x2e   : > { %p534_p12 = scmp.ne.s32.totalorder %s699_s28, %s533_s19  ;;  %s537_s21 = sshll.u32 %s615_s20, 4  ;;  %s538_s21 = int_to_ptr.vmem [resolvable:$false] %s537_s21 }
  0x2f   : > { %s539_s22 = scalar_lea.vmem %s538_s21, 7168  ;;  %p540_p10 = scmp.lt.s32.totalorder %s699_s28, %s538_s21 }
  0x30   : > { %p535_p0 = pnand %p534_p12, %p451_p13  ;;  %p541_p3 = scmp.lt.s32.totalorder %s539_s22, %s533_s19 }
  0x32   : > { %p536_p1 = pneg %p535_p0  ;;  %p542_p4 = por %p541_p3, %p540_p10 }
  0x34   : > { %p543_p5 = pnand %p542_p4, %p536_p1 }
  0x36   : > { %546 = shalt.err (!%p543_p5)
}
  0x37   : > { %s616_s24 = smov 512   ;;  %s617_s26 = smov 32  }
  0x38   : > { %112 = dma.hbm_to_vmem [thread:$0]  (%p451_p13), %s697_s2, %s686_s23, %s699_s28, %s689_s25, %s616_s24, %s616_s24, %s617_s26  }
  0x39 PF: > { %p456_p2 = scmp.ge.s32.totalorder %s613_s9, 1  ;;  %p114_p7 = scmp.lt.s32.totalorder %s613_s9, 5 }
  0x3b   : > { %p115_p8 = pnand %p456_p2, %p114_p7 }
  0x3c   : > { %s729_s27 = sand.u32 (!%p115_p8), 1, %s605_s7  }
  0x3d   : > { %118 = sbr.rel (%p115_p8) target bundleno = 140 (0x8c), region = 24  ;;  %s121_s30 = scalar_lea.sflag (!%p115_p8), [#allocation3], %s729_s27 }
  0x3e   : > { %s475_s29 = smul.u32 (!%p115_p8), 224, %s729_s27 }
  0x40   : > { %s735_s3 = scalar_lea.vmem (!%p115_p8), [#allocation2], %s475_s29 }
  0x44   : > { %592 = dma.done.wait (%p670_p6), %s121_s30, 3584  }
  0x45   : > { %594 = vsyncadd (%p670_p6), %s121_s30, 4294963712  ;;  %v155_v0 = vld [vmem:[%s735_s3] sm:$0xff]  ;;  %v156_v1 = vld [vmem:[%s735_s3 + $0x8] sm:$0xff]  ;;  %s763_s16 = scalar_lea.vmem [#allocation5], %s475_s29  ;;  %s352_s23 = scalar_lea.sflag [#allocation4], %s729_s27 }
  0x46   : > { %v157_v2 = vld [vmem:[%s735_s3 + $0x10] sm:$0xff]  ;;  %v183_v3 = vadd.f32 3.0, %v155_v0  ;;  %v184_v4 = vadd.f32 3.0, %v156_v1  ;;  %v158_v6 = vld [vmem:[%s735_s3 + $0x18] sm:$0xff]  ;;  %v159_v7 = vld [vmem:[%s735_s3 + $0x20] sm:$0xff]  ;;  %s359_s25 = smul.u32 (%p675_p9), 7, %s652_s10 }
  0x47   : > { %v185_v5 = vadd.f32 3.0, %v157_v2  ;;  %v160_v8 = vld [vmem:[%s735_s3 + $0x28] sm:$0xff]  ;;  %v186_v9 = vadd.f32 3.0, %v158_v6  ;;  %v187_v10 = vadd.f32 3.0, %v159_v7  ;;  %v161_v12 = vld [vmem:[%s735_s3 + $0x30] sm:$0xff]  ;;  %v162_v13 = vld [vmem:[%s735_s3 + $0x38] sm:$0xff] }
  0x48   : > { %v188_v11 = vadd.f32 3.0, %v160_v8  ;;  %v211_v14 = vmax.f32 %v183_v3, 0.0  ;;  %v212_v15 = vmax.f32 %v184_v4, 0.0  ;;  %v189_v17 = vadd.f32 3.0, %v161_v12  ;;  %v750_v30 = vld [vmem:[%s735_s3 + $0x40] sm:$0xff]  ;;  %v753_v31 = vld [vmem:[%s735_s3 + $0x48] sm:$0xff] }
  0x49   : > { %v213_v16 = vmax.f32 %v185_v5, 0.0  ;;  %v214_v18 = vmax.f32 %v186_v9, 0.0  ;;  %v215_v19 = vmax.f32 %v187_v10, 0.0  ;;  %v190_v21 = vadd.f32 3.0, %v162_v13  ;;  %v756_v32 = vld [vmem:[%s735_s3 + $0x50] sm:$0xff]  ;;  %v166_v43 = vld [vmem:[%s735_s3 + $0x58] sm:$0xff] }
  0x4a   : > { %v216_v20 = vmax.f32 %v188_v11, 0.0  ;;  %v239_v22 = vmin.f32 %v211_v14, 6.0  ;;  %v240_v23 = vmin.f32 %v212_v15, 6.0  ;;  %v217_v25 = vmax.f32 %v189_v17, 0.0  ;;  %v167_v44 = vld [vmem:[%s735_s3 + $0x60] sm:$0xff]  ;;  %v168_v45 = vld [vmem:[%s735_s3 + $0x68] sm:$0xff] }
  0x4b   : > { %v241_v24 = vmin.f32 %v213_v16, 6.0  ;;  %v242_v26 = vmin.f32 %v214_v18, 6.0  ;;  %v243_v27 = vmin.f32 %v215_v19, 6.0  ;;  %v218_v29 = vmax.f32 %v190_v21, 0.0  ;;  %v169_v58 = vld [vmem:[%s735_s3 + $0x70] sm:$0xff]  ;;  %v776_v63 = vld [vmem:[%s735_s3 + $0x78] sm:$0xff] }
  0x4c   : > { %v244_v28 = vmin.f32 %v216_v20, 6.0  ;;  %v267_v33 = vmul.f32 0.16666667, %v239_v22  ;;  %v268_v34 = vmul.f32 0.16666667, %v240_v23  ;;  %v245_v42 = vmin.f32 %v217_v25, 6.0 }
  0x4d   : > { %v269_v35 = vmul.f32 0.16666667, %v241_v24  ;;  %v270_v36 = vmul.f32 0.16666667, %v242_v26  ;;  %v271_v37 = vmul.f32 0.16666667, %v243_v27 }
  0x4e   : > { %v272_v38 = vmul.f32 0.16666667, %v244_v28  ;;  %v295_v39 = vmul.f32 %v267_v33, %v155_v0  ;;  %v296_v40 = vmul.f32 %v268_v34, %v156_v1  ;;  %v246_v49 = vmin.f32 %v218_v29, 6.0  ;;  %v788_v14 = vld [vmem:[%s735_s3 + $0x90] sm:$0xff]  ;;  %v174_v25 = vld [vmem:[%s735_s3 + $0x98] sm:$0xff]  ;;  %v175_v26 = vld [vmem:[%s735_s3 + $0xa0] sm:$0xff] }
  0x4f   : > { %v297_v41 = vmul.f32 %v269_v35, %v157_v2  ;;  %v298_v46 = vmul.f32 %v270_v36, %v158_v6  ;;  %v299_v47 = vmul.f32 %v271_v37, %v159_v7  ;;  %v273_v50 = vmul.f32 0.16666667, %v245_v42  ;;  %v176_v27 = vld [vmem:[%s735_s3 + $0xa8] sm:$0xff]  ;;  %s360_s28 = ssub.s32 (%p675_p9), 25, %s359_s25 }
  0x50   : > { %v300_v48 = vmul.f32 %v272_v38, %v160_v8  ;;  %323 = vst [vmem:[%s763_s16] sm:$0xff] %v295_v39  ;;  %324 = vst [vmem:[%s763_s16 + $0x8] sm:$0xff] %v296_v40  ;;  %v191_v51 = vadd.f32 3.0, %v750_v30  ;;  %v192_v52 = vadd.f32 3.0, %v753_v31  ;;  %v193_v53 = vadd.f32 3.0, %v756_v32  ;;  %p361_p6 = scmp.lt.s32.totalorder (%p675_p9), %s360_s28, 7 }
  0x51   : > { %325 = vst [vmem:[%s763_s16 + $0x10] sm:$0xff] %v297_v41  ;;  %326 = vst [vmem:[%s763_s16 + $0x18] sm:$0xff] %v298_v46  ;;  %v274_v54 = vmul.f32 0.16666667, %v246_v49  ;;  %v194_v55 = vadd.f32 3.0, %v166_v43  ;;  %v195_v56 = vadd.f32 3.0, %v167_v44  ;;  %v301_v59 = vmul.f32 %v273_v50, %v161_v12 }
  0x52   : > { %327 = vst [vmem:[%s763_s16 + $0x20] sm:$0xff] %v299_v47  ;;  %328 = vst [vmem:[%s763_s16 + $0x28] sm:$0xff] %v300_v48  ;;  %v196_v57 = vadd.f32 3.0, %v168_v45  ;;  %v219_v60 = vmax.f32 %v191_v51, 0.0  ;;  %v220_v61 = vmax.f32 %v192_v52, 0.0  ;;  %v221_v62 = vmax.f32 %v193_v53, 0.0 }
  0x53   : > { %v302_v0 = vmul.f32 %v274_v54, %v162_v13  ;;  %v222_v1 = vmax.f32 %v194_v55, 0.0  ;;  %v223_v2 = vmax.f32 %v195_v56, 0.0  ;;  %329 = vst [vmem:[%s763_s16 + $0x30] sm:$0xff] %v301_v59  ;;  %v197_v7 = vadd.f32 3.0, %v169_v58  ;;  %v782_v12 = vld [vmem:[%s735_s3 + $0x80] sm:$0xff]  ;;  %v785_v13 = vld [vmem:[%s735_s3 + $0x88] sm:$0xff] }
  0x54   : > { %v224_v3 = vmax.f32 %v196_v57, 0.0  ;;  %v247_v4 = vmin.f32 %v219_v60, 6.0  ;;  %v248_v5 = vmin.f32 %v220_v61, 6.0  ;;  %v249_v6 = vmin.f32 %v221_v62, 6.0  ;;  %v177_v52 = vld [vmem:[%s735_s3 + $0xb0] sm:$0xff]  ;;  %v178_v53 = vld [vmem:[%s735_s3 + $0xb8] sm:$0xff] }
  0x55   : > { %330 = vst [vmem:[%s763_s16 + $0x38] sm:$0xff] %v302_v0  ;;  %v250_v8 = vmin.f32 %v222_v1, 6.0  ;;  %v251_v9 = vmin.f32 %v223_v2, 6.0  ;;  %v198_v11 = vadd.f32 3.0, %v776_v63  ;;  %v225_v24 = vmax.f32 %v197_v7, 0.0  ;;  %v179_v59 = vld [vmem:[%s735_s3 + $0xc0] sm:$0xff] }
  0x56   : > { %v252_v10 = vmin.f32 %v224_v3, 6.0  ;;  %v275_v15 = vmul.f32 0.16666667, %v247_v4  ;;  %v276_v16 = vmul.f32 0.16666667, %v248_v5  ;;  %v202_v37 = vadd.f32 3.0, %v174_v25 }
  0x57   : > { %v277_v17 = vmul.f32 0.16666667, %v249_v6  ;;  %v278_v18 = vmul.f32 0.16666667, %v250_v8  ;;  %v279_v19 = vmul.f32 0.16666667, %v251_v9 }
  0x58   : > { %v280_v20 = vmul.f32 0.16666667, %v252_v10  ;;  %v303_v21 = vmul.f32 %v275_v15, %v750_v30  ;;  %v304_v22 = vmul.f32 %v276_v16, %v753_v31  ;;  %v226_v34 = vmax.f32 %v198_v11, 0.0  ;;  %v180_v60 = vld [vmem:[%s735_s3 + $0xc8] sm:$0xff]  ;;  %v181_v61 = vld [vmem:[%s735_s3 + $0xd0] sm:$0xff]  ;;  %v182_v7 = vld [vmem:[%s735_s3 + $0xd8] sm:$0xff] }
  0x59   : > { %v305_v23 = vmul.f32 %v277_v17, %v756_v32  ;;  %v306_v28 = vmul.f32 %v278_v18, %v166_v43  ;;  %v307_v29 = vmul.f32 %v279_v19, %v167_v44  ;;  %v253_v35 = vmin.f32 %v225_v24, 6.0 }
  0x5a   : > { %v308_v33 = vmul.f32 %v280_v20, %v168_v45  ;;  %331 = vst [vmem:[%s763_s16 + $0x40] sm:$0xff] %v303_v21  ;;  %332 = vst [vmem:[%s763_s16 + $0x48] sm:$0xff] %v304_v22  ;;  %v199_v30 = vadd.f32 3.0, %v782_v12  ;;  %v200_v31 = vadd.f32 3.0, %v785_v13  ;;  %v201_v32 = vadd.f32 3.0, %v788_v14 }
  0x5b   : > { %333 = vst [vmem:[%s763_s16 + $0x50] sm:$0xff] %v305_v23  ;;  %334 = vst [vmem:[%s763_s16 + $0x58] sm:$0xff] %v306_v28  ;;  %v254_v36 = vmin.f32 %v226_v34, 6.0  ;;  %v203_v38 = vadd.f32 3.0, %v175_v26  ;;  %v204_v39 = vadd.f32 3.0, %v176_v27  ;;  %v230_v45 = vmax.f32 %v202_v37, 0.0 }
  0x5c   : > { %335 = vst [vmem:[%s763_s16 + $0x60] sm:$0xff] %v307_v29  ;;  %336 = vst [vmem:[%s763_s16 + $0x68] sm:$0xff] %v308_v33  ;;  %v281_v40 = vmul.f32 0.16666667, %v253_v35  ;;  %v227_v41 = vmax.f32 %v199_v30, 0.0  ;;  %v228_v42 = vmax.f32 %v200_v31, 0.0 }
  0x5d   : > { %v229_v43 = vmax.f32 %v201_v32, 0.0  ;;  %v282_v44 = vmul.f32 0.16666667, %v254_v36  ;;  %v231_v46 = vmax.f32 %v203_v38, 0.0  ;;  %v232_v47 = vmax.f32 %v204_v39, 0.0 }
  0x5e   : > { %v309_v48 = vmul.f32 %v281_v40, %v169_v58  ;;  %v255_v49 = vmin.f32 %v227_v41, 6.0  ;;  %v256_v50 = vmin.f32 %v228_v42, 6.0  ;;  %v258_v55 = vmin.f32 %v230_v45, 6.0 }
  0x5f   : > { %v257_v51 = vmin.f32 %v229_v43, 6.0  ;;  %v310_v54 = vmul.f32 %v282_v44, %v776_v63  ;;  %v259_v56 = vmin.f32 %v231_v46, 6.0  ;;  %v260_v57 = vmin.f32 %v232_v47, 6.0 }
  0x60   : > { %337 = vst [vmem:[%s763_s16 + $0x70] sm:$0xff] %v309_v48  ;;  %v283_v62 = vmul.f32 0.16666667, %v255_v49  ;;  %v284_v0 = vmul.f32 0.16666667, %v256_v50  ;;  %v205_v6 = vadd.f32 3.0, %v177_v52 }
  0x61   : > { %v285_v58 = vmul.f32 0.16666667, %v257_v51  ;;  %338 = vst [vmem:[%s763_s16 + $0x78] sm:$0xff] %v310_v54  ;;  %v286_v1 = vmul.f32 0.16666667, %v258_v55  ;;  %v206_v11 = vadd.f32 3.0, %v178_v53 }
  0x62   : > { %v287_v2 = vmul.f32 0.16666667, %v259_v56  ;;  %v288_v3 = vmul.f32 0.16666667, %v260_v57  ;;  %v311_v63 = vmul.f32 %v283_v62, %v782_v12  ;;  %v312_v4 = vmul.f32 %v284_v0, %v785_v13 }
  0x63   : > { %v313_v5 = vmul.f32 %v285_v58, %v788_v14  ;;  %v314_v8 = vmul.f32 %v286_v1, %v174_v25  ;;  %v233_v15 = vmax.f32 %v205_v6, 0.0  ;;  %v207_v16 = vadd.f32 3.0, %v179_v59 }
  0x64   : > { %v315_v9 = vmul.f32 %v287_v2, %v175_v26  ;;  %v316_v10 = vmul.f32 %v288_v3, %v176_v27  ;;  %339 = vst [vmem:[%s763_s16 + $0x80] sm:$0xff] %v311_v63  ;;  %340 = vst [vmem:[%s763_s16 + $0x88] sm:$0xff] %v312_v4  ;;  %v208_v17 = vadd.f32 3.0, %v180_v60  ;;  %v209_v12 = vadd.f32 3.0, %v181_v61 }
  0x65   : > { %341 = vst [vmem:[%s763_s16 + $0x90] sm:$0xff] %v313_v5  ;;  %342 = vst [vmem:[%s763_s16 + $0x98] sm:$0xff] %v314_v8  ;;  %v234_v13 = vmax.f32 %v206_v11, 0.0  ;;  %v210_v18 = vadd.f32 3.0, %v182_v7  ;;  %v261_v14 = vmin.f32 %v233_v15, 6.0  ;;  %v235_v19 = vmax.f32 %v207_v16, 0.0 }
  0x66   : > { %343 = vst [vmem:[%s763_s16 + $0xa0] sm:$0xff] %v315_v9  ;;  %344 = vst [vmem:[%s763_s16 + $0xa8] sm:$0xff] %v316_v10  ;;  %v236_v20 = vmax.f32 %v208_v17, 0.0  ;;  %v237_v21 = vmax.f32 %v209_v12, 0.0 }
  0x67   : > { %v262_v22 = vmin.f32 %v234_v13, 6.0  ;;  %v238_v23 = vmax.f32 %v210_v18, 0.0  ;;  %v289_v24 = vmul.f32 0.16666667, %v261_v14  ;;  %v263_v25 = vmin.f32 %v235_v19, 6.0 }
  0x68   : > { %v264_v26 = vmin.f32 %v236_v20, 6.0  ;;  %v265_v27 = vmin.f32 %v237_v21, 6.0 }
  0x69   : > { %v290_v28 = vmul.f32 0.16666667, %v262_v22  ;;  %v266_v29 = vmin.f32 %v238_v23, 6.0  ;;  %v317_v33 = vmul.f32 %v289_v24, %v177_v52  ;;  %v291_v34 = vmul.f32 0.16666667, %v263_v25  ;;  %358 = sbr.rel (!%p675_p9) target bundleno = 140 (0x8c), region = 32 }
  0x6a   : > { %v292_v35 = vmul.f32 0.16666667, %v264_v26  ;;  %v293_v30 = vmul.f32 0.16666667, %v265_v27 }
  0x6b   : > { %v318_v31 = vmul.f32 %v290_v28, %v178_v53  ;;  %v294_v32 = vmul.f32 0.16666667, %v266_v29  ;;  %345 = vst [vmem:[%s763_s16 + $0xb0] sm:$0xff] %v317_v33  ;;  %v319_v36 = vmul.f32 %v291_v34, %v179_v59 }
  0x6c   : > { %v320_v37 = vmul.f32 %v292_v35, %v180_v60  ;;  %v321_v38 = vmul.f32 %v293_v30, %v181_v61 }
  0x6d   : > { %346 = vst [vmem:[%s763_s16 + $0xb8] sm:$0xff] %v318_v31  ;;  %v322_v39 = vmul.f32 %v294_v32, %v182_v7  ;;  %347 = vst [vmem:[%s763_s16 + $0xc0] sm:$0xff] %v319_v36 }
  0x6e   : > { %348 = vst [vmem:[%s763_s16 + $0xc8] sm:$0xff] %v320_v37  ;;  %349 = vst [vmem:[%s763_s16 + $0xd0] sm:$0xff] %v321_v38 }
  0x6f   : > { %350 = vst [vmem:[%s763_s16 + $0xd8] sm:$0xff] %v322_v39 }
  0x70   : > { %s904_s28 = smov (!%p361_p6, %s360_s28), 7 }
  0x71   : > { %s833_s2 = sshll.u32 %s904_s28, 9 }
  0x72   : > { %s366_s4 = ssub.s32 3584, %s833_s2 }
  0x73   : > { %367 = vsyncadd %s352_s23, %s366_s4  ;;  %p459_p10 = scmp.ne.s32.totalorder %s833_s2, 0  ;;  %s473_s17 = smul.u32 3584, %s652_s10 }
  0x74   : > { %s373_s5 = sshll.u32 %s763_s16, 4  ;;  %s618_s20 = smov [#allocation5]   ;;  %s846_s5 = int_to_ptr.vmem [resolvable:$true] %s373_s5 }
  0x75   : > { %s844_s14 = scalar_lea.hbm %s892_s1, %s473_s17  ;;  %s547_s19 = scalar_lea.vmem %s846_s5, %s833_s2 }
  0x76   : > { %p548_p9 = scmp.ne.s32.totalorder %s846_s5, %s547_s19  ;;  %s551_s21 = sshll.u32 %s618_s20, 4  ;;  %s552_s21 = int_to_ptr.vmem [resolvable:$false] %s551_s21 }
  0x77   : > { %s553_s10 = scalar_lea.vmem %s552_s21, 7168  ;;  %p554_p12 = scmp.lt.s32.totalorder %s846_s5, %s552_s21 }
  0x78   : > { %p549_p13 = pnand %p548_p9, %p459_p10  ;;  %p555_p0 = scmp.lt.s32.totalorder %s553_s10, %s547_s19 }
  0x7a   : > { %p550_p11 = pneg %p549_p13  ;;  %p556_p1 = por %p555_p0, %p554_p12 }
  0x7c   : > { %p557_p3 = pnand %p556_p1, %p550_p11 }
  0x7e   : > { %560 = shalt.err (!%p557_p3)
}
  0x7f   : > { %s561_s22 = scalar_lea.hbm %s844_s14, %s833_s2  ;;  %s565_s29 = scalar_lea.hbm %s892_s1, 12800 }
  0x80   : > { %p562_p4 = scmp.ne.s32.totalorder %s844_s14, %s561_s22  ;;  %p566_p7 = scmp.lt.u32.totalorder %s844_s14, %s892_s1 }
  0x81   : > { %p567_p8 = scmp.lt.u32.totalorder %s565_s29, %s561_s22  ;;  %p569_p9 = scmp.lt.u32.totalorder %s561_s22, %s844_s14 }
  0x82   : > { %p563_p5 = pnand %p562_p4, %p459_p10 }
  0x83   : > { %p568_p6 = por %p567_p8, %p566_p7 }
  0x84   : > { %p564_p2 = pneg %p563_p5 }
  0x85   : > { %p570_p13 = por %p569_p9, %p568_p6 }
  0x87   : > { %p571_p11 = pnand %p570_p13, %p564_p2 }
  0x89   : > { %574 = shalt.err (!%p571_p11)
}
  0x8a   : > { %s619_s16 = smov 512   ;;  %s620_s25 = smov 32  }
  0x8b   : > { %379 = dma.vmem_to_hbm [thread:$0]  (%p459_p10), %s846_s5, %s833_s2, %s844_s14, %s352_s23, %s619_s16, %s619_s16, %s620_s25  }
  0x8c PF: > { %p482_p12 = scmp.ge.s32.totalorder %s613_s9, 2  ;;  %s388_s28 = sand.u32 1, %s601_s6  }
  0x8d   : > { %p896_p0 = scmp.ne.s32.totalorder %s895_s18, 0  ;;  %s389_s4 = scalar_lea.sflag [#allocation4], %s388_s28 }
  0x8f   : > { %p479_p1 = pnand %p482_p12, %p896_p0 }
  0x91   : > { %596 = dma.done.wait (!%p479_p1), %s389_s4, 3584  }
  0x92   : > { %598 = vsyncadd (!%p479_p1), %s389_s4, 4294963712  ;;  %p14_p3 = scmp.ge.s32.totalorder %s656_s12, 6   ;;  %s897_s6 = smov %s605_s7 }
  0x93   : > { %s898_s7 = smov %s609_s8  ;;  %s899_s8 = smov %s668_s15 }
  0x94   : > { %s900_s9 = smov %s656_s12  ;;  %16 = sbr.rel (!%p14_p3) target bundleno = 5 (0x5), region = 69 }
  0x9b   :  { %394 = vsyncpa [#allocation3], 1 }
  0x9c   :  { %396 = vsyncpa [#allocation3 + $0x1], 1 }
  0x9d   :  { %397 = vsyncpa [#allocation4], 1 }
  0x9e   :  { %399 = vsyncpa [#allocation4 + $0x1], 1 }

</bundles_post_ra>
